<compile_context>
chip_gen: v6e
topology: v6e:2x2x1
jax: 0.10.0
libtpu: 0.0.40
codegen_flags: <defaults>
</compile_context>

<pallas_src>
import functools

import jax
import jax.numpy as jnp
from jax.experimental import pallas as pl
from jax.experimental.pallas import tpu as pltpu


# ---------------------------------------------------------------------------
# Kernels
# ---------------------------------------------------------------------------
def _fullhw_kernel(x_ref, w_ref, b_ref, o_ref):
    # x_ref: (b_t, C, HW)   w_ref: (C, K) f32, already scaled by 1/HW   b_ref: (1, K) f32
    pooled = jnp.sum(x_ref[...], axis=-1, dtype=jnp.float32)            # (b_t, C), XLU reduce
    out = jnp.dot(pooled, w_ref[...], preferred_element_type=jnp.float32) + b_ref[...]
    o_ref[...] = out.astype(o_ref.dtype)


def _ctiled_kernel(x_ref, w_ref, b_ref, o_ref, acc_ref):
    # x_ref: (b_t, c_t, HW)   w_ref: (c_t, K) f32 (1/HW folded)   b_ref: (1, K) f32
    # o_ref: (b_t, K)         acc_ref: (b_t, K) f32 matmul accumulator over channel tiles
    ci = pl.program_id(1)

    @pl.when(ci == 0)
    def _():
        acc_ref[...] = jnp.zeros_like(acc_ref)

    pooled = jnp.sum(x_ref[...], axis=-1, dtype=jnp.float32)            # (b_t, c_t)
    acc_ref[...] += jnp.dot(pooled, w_ref[...], preferred_element_type=jnp.float32)

    @pl.when(ci == pl.num_programs(1) - 1)
    def _():
        o_ref[...] = (acc_ref[...] + b_ref[...]).astype(o_ref.dtype)


# ---------------------------------------------------------------------------
# Generation-aware planning
# ---------------------------------------------------------------------------
def _tpu_memory_plan():
    """Per-generation (x double-buffer budget, vmem_limit_bytes, multi-TC?)."""
    kind = ""
    try:
        kind = jax.devices()[0].device_kind.lower()
    except Exception:  # pragma: no cover - CPU / unusual backends
        pass
    vmem_cap = None
    try:
        vmem_cap = int(pltpu.get_tpu_info().vmem_capacity_bytes)
    except Exception:
        pass

    if "v7" in kind or (vmem_cap is not None and vmem_cap <= (64 << 20)):
        # v7x: 64 MiB VMEM per TensorCore, 2 TCs/chip, ~3.2 TB/s HBM.
        return {"x_budget": 36 << 20, "vmem_limit": 48 << 20, "multi_core": True}
    if "v6" in kind:
        # v6e: 128 MiB VMEM (32 MiB scoped default), ~1.4 TB/s HBM.
        return {"x_budget": 64 << 20, "vmem_limit": 96 << 20, "multi_core": False}
    if "v5" in kind:
        # v5e: 128 MiB VMEM (16 MiB scoped default), ~820 GB/s HBM.
        return {"x_budget": 40 << 20, "vmem_limit": 56 << 20, "multi_core": False}
    # Unknown generation: numbers that fit every TPU's per-core VMEM.
    return {"x_budget": 32 << 20, "vmem_limit": 48 << 20, "multi_core": False}


def _candidate_tiles(n):
    """Divisor tiles of n satisfying the sublane rule (multiple of 8, or n itself)."""
    cands = {n}
    for t in (1024, 512, 256, 128, 64, 32, 16, 8):
        if t < n and n % t == 0:
            cands.add(t)
    return sorted(cands, reverse=True)


def _select_plan(B, C, HW, itemsize, x_budget, prefer_batch_split):
    bt_cands = _candidate_tiles(B)
    if prefer_batch_split:
        # v7x: make sure the "parallel" batch axis has >= 2 tiles so both TCs work.
        split = [t for t in bt_cands if B // t >= 2]
        if split:
            bt_cands = split

    # Plan A: full-HW blocks (single grid step per batch tile, no reduction loop).
    for bt in bt_cands:
        if 2 * bt * C * HW * itemsize <= x_budget:
            return "full_hw", bt, None

    # Plan B: smallest batch tile, tile channels (reduction axis last), full HW per row.
    bt = bt_cands[-1]
    ct_cands = _candidate_tiles(C)
    for ct in ct_cands:
        if ct < C and 2 * bt * ct * HW * itemsize <= x_budget:
            return "c_tiled", bt, ct
    ct = ct_cands[-1]
    if ct >= C:
        return "full_hw", bt, None  # C too small to sub-tile; best effort
    return "c_tiled", bt, ct        # smallest legal channel tile; best effort


# ---------------------------------------------------------------------------
# Wrapper
# ---------------------------------------------------------------------------
def regression_head(x, weight, bias, *, b_tile=None, c_tile=None):
    """x: (B, C, H, W) NCHW; weight: (K, C, 1, 1) torch Conv2d layout; bias: (K,)."""
    B, C, H, W = x.shape
    K = weight.shape[0]
    HW = H * W

    x_flat = x.reshape(B, C, HW)
    # Pre-transposed f32 weight with the mean's 1/(H*W) folded in; f32 bias.
    w_ck = weight.reshape(K, C).T.astype(jnp.float32) * jnp.float32(1.0 / HW)  # (C, K)
    b_2d = bias.reshape(1, K).astype(jnp.float32)

    plan = _tpu_memory_plan()
    mode, auto_bt, auto_ct = _select_plan(
        B, C, HW, x.dtype.itemsize, plan["x_budget"], plan["multi_core"])

    b_t = b_tile if b_tile is not None else auto_bt
    if c_tile is not None:
        c_t = c_tile
        mode = "c_tiled" if c_t < C else "full_hw"
    else:
        c_t = auto_ct
    assert B % b_t == 0, "batch tile must divide B"

    if mode == "full_hw":
        compiler_params = pltpu.CompilerParams(
            dimension_semantics=("parallel",),
            vmem_limit_bytes=plan["vmem_limit"],
        )
        return pl.pallas_call(
            _fullhw_kernel,
            out_shape=jax.ShapeDtypeStruct((B, K), x.dtype),
            grid_spec=pltpu.PrefetchScalarGridSpec(
                num_scalar_prefetch=0,
                grid=(B // b_t,),
                in_specs=[
                    # activations: full (C, HW) per batch tile -> contiguous DMA rows
                    pl.BlockSpec((b_t, C, HW), lambda bi: (bi, 0, 0)),
                    # weight / bias: constant index maps -> DMA'd once, stay resident
                    pl.BlockSpec((C, K), lambda bi: (0, 0)),
                    pl.BlockSpec((1, K), lambda bi: (0, 0)),
                ],
                out_specs=pl.BlockSpec((b_t, K), lambda bi: (bi, 0)),
            ),
            compiler_params=compiler_params,
        )(x_flat, w_ck, b_2d)

    # Channel-tiled reduction plan.
    assert C % c_t == 0, "channel tile must divide C"
    compiler_params = pltpu.CompilerParams(
        dimension_semantics=("parallel", "arbitrary"),  # channel axis is the reduction
        vmem_limit_bytes=plan["vmem_limit"],
    )
    return pl.pallas_call(
        _ctiled_kernel,
        out_shape=jax.ShapeDtypeStruct((B, K), x.dtype),
        grid_spec=pltpu.PrefetchScalarGridSpec(
            num_scalar_prefetch=0,
            grid=(B // b_t, C // c_t),
            in_specs=[
                pl.BlockSpec((b_t, c_t, HW), lambda bi, ci: (bi, ci, 0)),
                pl.BlockSpec((c_t, K), lambda bi, ci: (ci, 0)),
                pl.BlockSpec((1, K), lambda bi, ci: (0, 0)),
            ],
            # same output block across the channel (reduction) axis -> resident output
            out_specs=pl.BlockSpec((b_t, K), lambda bi, ci: (bi, 0)),
            scratch_shapes=[pltpu.VMEM((b_t, K), jnp.float32)],
        ),
        compiler_params=compiler_params,
    )(x_flat, w_ck, b_2d)


# ---------------------------------------------------------------------------
# Self-test
# ---------------------------------------------------------------------------
if __name__ == "__main__":
    def reference(x, weight, bias):
        K = weight.shape[0]
        pooled = jnp.mean(x.astype(jnp.float32), axis=(2, 3))              # (B, C)
        return pooled @ weight.reshape(K, -1).T.astype(jnp.float32) + bias.astype(jnp.float32)

    keys = jax.random.split(jax.random.PRNGKey(0), 6)

    # Test 1: small head -> auto-selected full-HW (single-step) plan.
    B, C, H, W, K = 2, 4, 16, 16, 3
    x = jax.random.normal(keys[0], (B, C, H, W), dtype=jnp.float32)
    weight = jax.random.normal(keys[1], (K, C, 1, 1), dtype=jnp.float32) * 0.1
    bias = jax.random.normal(keys[2], (K,), dtype=jnp.float32) * 0.1
    out = jax.block_until_ready(regression_head(x, weight, bias))
    assert out.shape == (B, K)
    assert jnp.allclose(out, reference(x, weight, bias), atol=1e-5, rtol=1e-5)

    # Test 2: force the channel-tiled reduction path (c_tile=8 over C=16).
    B2, C2, H2, W2, K2 = 2, 16, 8, 8, 3
    x2 = jax.random.normal(keys[3], (B2, C2, H2, W2), dtype=jnp.float32)
    w2 = jax.random.normal(keys[4], (K2, C2, 1, 1), dtype=jnp.float32) * 0.1
    b2 = jax.random.normal(keys[5], (K2,), dtype=jnp.float32) * 0.1
    out2 = jax.block_until_ready(regression_head(x2, w2, b2, c_tile=8))
    assert out2.shape == (B2, K2)
    assert jnp.allclose(out2, reference(x2, w2, b2), atol=1e-5, rtol=1e-5)

    print("KERNEL_OK")
</pallas_src>

<mosaic_0001>
module attributes {stable_mosaic.version = 11 : i64} {
  func.func @_fullhw_kernel(%arg0: i32, %arg1: memref<2x4x256xf32, #tpu.memory_space<vmem>>, %arg2: memref<4x3xf32, #tpu.memory_space<vmem>>, %arg3: memref<1x3xf32, #tpu.memory_space<vmem>>, %arg4: memref<2x3xf32, #tpu.memory_space<vmem>>) attributes {dimension_semantics = [#tpu.dimension_semantics<parallel>], iteration_bounds = array<i64: 1>, scalar_prefetch = 0 : i64, scratch_operands = 0 : i64, tpu.core_type = #tpu.core_type<tc>, window_params = [{transform_indices = @transform_0, window_bounds = array<i64: 2, 4, 256>}, {pipeline_mode = #tpu.pipeline_mode<synchronous>, transform_indices = @transform_1, window_bounds = array<i64: 4, 3>}, {pipeline_mode = #tpu.pipeline_mode<synchronous>, transform_indices = @transform_2, window_bounds = array<i64: 1, 3>}, {transform_indices = @transform_3, window_bounds = array<i64: 2, 3>}]} {
    %c0 = arith.constant 0 : index
    %c0_0 = arith.constant 0 : index
    %c0_1 = arith.constant 0 : index
    %0 = vector.load %arg1[%c0, %c0_0, %c0_1] : memref<2x4x256xf32, #tpu.memory_space<vmem>>, vector<2x4x256xf32>
    %cst = arith.constant dense<0.000000e+00> : vector<2x4xf32>
    %1 = vector.multi_reduction <add>, %0, %cst [2] : vector<2x4x256xf32> to vector<2x4xf32>
    %c0_2 = arith.constant 0 : index
    %c0_3 = arith.constant 0 : index
    %2 = vector.load %arg2[%c0_2, %c0_3] : memref<4x3xf32, #tpu.memory_space<vmem>>, vector<4x3xf32>
    %cst_4 = arith.constant dense<0.000000e+00> : vector<2x3xf32>
    %3 = tpu.matmul %1, %2, %cst_4 {dimension_numbers = #tpu.dot_dimension_numbers<[1], [0], [0], [1], [0, 0, 1, 1], [], []>} : vector<2x4xf32>, vector<4x3xf32>, vector<2x3xf32> -> vector<2x3xf32>
    %c0_5 = arith.constant 0 : index
    %c0_6 = arith.constant 0 : index
    %4 = vector.load %arg3[%c0_5, %c0_6] : memref<1x3xf32, #tpu.memory_space<vmem>>, vector<1x3xf32>
    %5 = vector.broadcast %4 : vector<1x3xf32> to vector<2x3xf32>
    %6 = arith.addf %3, %5 : vector<2x3xf32>
    %c0_7 = arith.constant 0 : index
    %c0_8 = arith.constant 0 : index
    %7 = vector.load %arg4[%c0_7, %c0_8] : memref<2x3xf32, #tpu.memory_space<vmem>>, vector<2x3xf32>
    tpu.vector_store %arg4[%c0_7, %c0_8], %6 {strides = array<i32>} : memref<2x3xf32, #tpu.memory_space<vmem>>, vector<2x3xf32>,
    return
  }
  func.func @transform_0(%arg0: i32) -> (i32, i32, i32) {
    %c0_i32 = arith.constant 0 : i32
    %c0_i32_0 = arith.constant 0 : i32
    %c0_i32_1 = arith.constant 0 : i32
    return %arg0, %c0_i32, %c0_i32_0 : i32, i32, i32
  }
  func.func @transform_1(%arg0: i32) -> (i32, i32) {
    %c0_i32 = arith.constant 0 : i32
    %c0_i32_0 = arith.constant 0 : i32
    %c0_i32_1 = arith.constant 0 : i32
    return %c0_i32, %c0_i32_0 : i32, i32
  }
  func.func @transform_2(%arg0: i32) -> (i32, i32) {
    %c0_i32 = arith.constant 0 : i32
    %c0_i32_0 = arith.constant 0 : i32
    %c0_i32_1 = arith.constant 0 : i32
    return %c0_i32, %c0_i32_0 : i32, i32
  }
  func.func @transform_3(%arg0: i32) -> (i32, i32) {
    %c0_i32 = arith.constant 0 : i32
    %c0_i32_0 = arith.constant 0 : i32
    return %arg0, %c0_i32 : i32, i32
  }
}

</mosaic_0001>

<bundles_post_ra>
// kernel: tpu_custom_call.1
= control target key start
LH: loop header
LB: loop body
LE: loop exit
PB: predicated region body
PF: predicated region fallthrough
CT: control target
= control target key end

     0   :  { %8 = vsyncpa [#allocation3], 0  ;;  %s305_s0 = inlined_call_operand.hbm [shape: f32[2,4,256], index: 0, kind: input, shape index: {}]   ;;  %s306_s1 = inlined_call_operand.hbm [shape: f32[4,3], index: 1, kind: input, shape index: {}]   ;;  %s307_s2 = inlined_call_operand.vmem [shape: f32[1,3], index: 2, kind: input, shape index: {}]   ;;  %s308_s3 = inlined_call_operand.hbm [shape: f32[2,3], index: 3, kind: output, shape index: {}]  }
   0x1   :  { %9 = vsyncpa [#allocation6], 0 }
   0x2   :  { %10 = vsyncpa [#allocation4], 0  ;;  %s261_s12 = smov [#allocation2]  }
   0x3   :  { %s16_s13 = sshll.u32 %s261_s12, 4  ;;  %s17_s13 = int_to_ptr.vmem [resolvable:$true] %s16_s13 }
   0x4   :  { %s203_s14 = scalar_lea.vmem %s17_s13, 256  ;;  %p208_p1 = scmp.lt.s32.totalorder %s17_s13, %s17_s13 }
   0x5   :  { %p204_p0 = scmp.ne.s32.totalorder %s17_s13, %s203_s14  ;;  %p209_p2 = scmp.lt.s32.totalorder %s203_s14, %s203_s14 }
   0x7   :  { %p210_p3 = por %p209_p2, %p208_p1 }
   0x9   :  { %p211_p4 = pnand %p210_p3, %p204_p0 }
   0xb   :  { %214 = shalt.err (!%p211_p4)
}
   0xc   :  { %s262_s15 = smov 128   ;;  %s263_s16 = smov 8  }
   0xd   :  { %22 = dma.hbm_to_vmem [thread:$0]  %s305_s0, 256, %s17_s13, [#allocation3], %s262_s15, %s262_s15, %s263_s16  }
   0xe   :  { %s264_s19 = smov [#allocation5]  }
   0xf   :  { %s29_s20 = sshll.u32 %s264_s19, 4  ;;  %s30_s20 = int_to_ptr.vmem [resolvable:$true] %s29_s20 }
  0x10   :  { %s223_s21 = scalar_lea.vmem %s30_s20, 64  ;;  %p228_p6 = scmp.lt.s32.totalorder %s30_s20, %s30_s20 }
  0x11   :  { %p224_p5 = scmp.ne.s32.totalorder %s30_s20, %s223_s21  ;;  %p229_p7 = scmp.lt.s32.totalorder %s223_s21, %s223_s21 }
  0x13   :  { %p230_p8 = por %p229_p7, %p228_p6 }
  0x15   :  { %p231_p9 = pnand %p230_p8, %p224_p5 }
  0x17   :  { %234 = shalt.err (!%p231_p9)
}
  0x18   :  { %32 = dma.hbm_to_vmem [thread:$0]  %s306_s1, 64, %s30_s20, [#allocation6]  }
  0x19   :  { %255 = dma.done.wait [#allocation3], 256  }
  0x1a   :  { %256 = vsyncadd [#allocation3], 4294967040 }
  0x1b   :  { %257 = dma.done.wait [#allocation6], 64  }
  0x1c   :  { %258 = vsyncadd [#allocation6], 4294967232  ;;  %vm49_vm0 = vcmask 1043456   ;;  %v41_v0 = vld [vmem:[#allocation2] sm:$0xff]  ;;  %v42_v1 = vld [vmem:[#allocation2 + $0x8] sm:$0xff]  ;;  %v265_v11 = vmov 0.0   ;;  %v70_v12 = vlaneseq }
  0x1d   :  { %v45_v2 = vcombine.high %v41_v0, %v41_v0  ;;  %v50_v3 = vsel %vm49_vm0, %v41_v0, 0.0  ;;  %v46_v4 = vcombine.high %v42_v1, %v42_v1  ;;  %v55_v6 = vsel %vm49_vm0, %v42_v1, 0.0  ;;  %v60_v10 = vld [vmem:[#allocation5] sm:$0xf]  ;;  %181 = vmatprep.subr.mxu0 %v265_v11  ;;  %v176_v21 = vld [vmem:[%s307_s2] ss:$0 sm:$0xff] }
  0x1e   :  { %vm266_vm1 = vmmov 0   ;;  %182 = vmatpush3.msk.msra.mxu0 %vm49_vm0, %v60_v10  ;;  %v71_v13 = vand.u32 127, %v70_v12  ;;  %v73_v14 = vshrl.u32 %v70_v12, 7  ;;  %vm80_vm2 = vcmask 1041409   ;;  %s267_s24 = smov [#allocation7]  }
  0x1f   :  { %v51_v5 = vsel %vm49_vm0, %v45_v2, 0.0  ;;  %v56_v7 = vsel %vm49_vm0, %v46_v4, 0.0  ;;  %183 = vmatprep.mubr.msk.f32.mxu0 %vm266_vm1, %v265_v11  ;;  %vm82_vm3 = vcmask 31744   ;;  %s166_s25 = sshll.u32 %s267_s24, 4  ;;  %vm158_vm4 = vcmask 17408   ;;  %s167_s25 = int_to_ptr.vmem [resolvable:$true] %s166_s25 }
  0x20   :  { %v52_v8 = vadd.f32 %v51_v5, %v50_v3  ;;  %v57_v9 = vadd.f32 %v56_v7, %v55_v6  ;;  %v74_v16 = vsub.s32 %v71_v13, %v73_v14  ;;  %s235_s26 = scalar_lea.vmem %s167_s25, 32  ;;  %p240_p11 = scmp.lt.s32.totalorder %s167_s25, %s167_s25 }
  0x21   :  { %p236_p10 = scmp.ne.s32.totalorder %s167_s25, %s235_s26  ;;  %p241_p12 = scmp.lt.s32.totalorder %s235_s26, %s235_s26 }
  0x22   :  { %53 = vadd.xlane.f32.xlu0 %v52_v8 }
  0x23   :  { %p242_p13 = por %p241_p12, %p240_p11 }
  0x25   :  { %p243_p0 = pnand %p242_p13, %p236_p10 }
  0x26   :  { %58 = vadd.xlane.f32.xlu0 %v57_v9 }
  0xab   :  { %v54_v15 = vpop.xlane.xlu0 %53 }
  0xac   :  { %v75_v18 = vrot.slane %v54_v15, %v74_v16 }
  0xaf   :  { %v59_v17 = vpop.xlane.xlu0 %58 }
  0xb0   :  { %v79_v19 = vrot.slane %v59_v17, %v74_v16 }
  0xb2   :  { %v81_v20 = vsel %vm80_vm2, %v79_v19, %v75_v18 }
  0xb3   :  { %184 = vmatmul.mubr.msk.f32.vlgmr.msra.gmra.mxu0 %vm82_vm3, %v81_v20 }
 0x173   :  { %v154_v22 = vpop.f32.mrf.mxu0 }
 0x174   :  { %v155_v23 = vadd.f32 %v176_v21, %v154_v22 }
 0x175   :  { %v185_v24 = vpop.f32.mrf.mxu0 }
 0x176   :  { %159 = vst.msk [vmem:[#allocation7] sm:$0x3] %vm158_vm4, %v155_v23 }
 0x177   :  { %246 = shalt.err (!%p243_p0)
}
 0x178   :  { %169 = dma.vmem_to_hbm [thread:$0]  %s167_s25, 32, %s308_s3, [#allocation4]  }
 0x179   :  { %259 = dma.done.wait [#allocation4], 32  }
 0x17a   :  { %260 = vsyncadd [#allocation4], 4294967264 }
 0x17b   :  { %173 = vsyncpa [#allocation3], 1 }
 0x17c   :  { %174 = vsyncpa [#allocation6], 1 }
 0x17d   :  { %175 = vsyncpa [#allocation4], 1 }

</bundles_post_ra>
